<compile_context>
chip_gen: v5e
topology: v5e:2x2
jax: 0.10.0
libtpu: 0.0.40
codegen_flags: <defaults>
</compile_context>

<pallas_src>
import jax
import jax.numpy as jnp
from jax import lax
from jax.experimental import pallas as pl
from jax.experimental.pallas import tpu as pltpu

LEAKY_SLOPE = 0.01   # F.leaky_relu default negative_slope
LN_EPS = 1e-5        # nn.LayerNorm default eps
SUBLANE = 8


def _round_up(n, m):
    return ((n + m - 1) // m) * m


def _leaky_relu(x):
    return jnp.where(x > 0, x, LEAKY_SLOPE * x)


def dqn_kernel(x_ref, w0_ref, w1_ref, wo_ref, pk_ref, o_ref):
    """Fused forward pass for one (TB, in_size) batch tile.

    Weights (w0/w1/wo) and the packed parameter rows (pk) use constant
    index_maps, so their blocks are DMA'd once and stay resident in VMEM
    across all batch tiles.
    """
    h0 = w0_ref.shape[1]
    h1 = w1_ref.shape[1]
    n_out = wo_ref.shape[1]
    cdt = w0_ref.dtype                       # MXU operand dtype (bf16 or f32)

    w0 = w0_ref[...]
    w1 = w1_ref[...]
    wo = wo_ref[...]
    pk = pk_ref[...]                         # (8, max_width) f32 packed rows
    b0 = pk[0:1, :h0]
    gamma = pk[1:2, :h0]
    beta = pk[2:3, :h0]
    b1 = pk[3:4, :h1]
    bo = pk[4:5, :n_out]

    x = x_ref[...].astype(cdt)

    # layers[0]: Linear + LeakyReLU (f32 accumulation on the MXU).
    h = jnp.dot(x, w0, preferred_element_type=jnp.float32) + b0
    h = _leaky_relu(h)

    # LayerNorm over the (unpadded) hidden width; statistics in f32.
    mean = jnp.mean(h, axis=-1, keepdims=True)
    centered = h - mean
    var = jnp.mean(jnp.square(centered), axis=-1, keepdims=True)
    h = centered * lax.rsqrt(var + LN_EPS) * gamma + beta

    # layers[1]: Linear + LeakyReLU.
    h = jnp.dot(h.astype(cdt), w1, preferred_element_type=jnp.float32) + b1
    h = _leaky_relu(h)

    # output: Linear (no activation), stored at real width.
    out = jnp.dot(h.astype(cdt), wo, preferred_element_type=jnp.float32) + bo
    o_ref[...] = out.astype(o_ref.dtype)


def _choose_batch_tile(B, batch_tile):
    """>=2 tiles when B > 8 (v7x dual-TC sharding) and bounded row padding."""
    if B <= SUBLANE:
        return SUBLANE
    n_tiles = max(2, pl.cdiv(B, batch_tile))
    return _round_up(pl.cdiv(B, n_tiles), SUBLANE)


def dq_network_forward(x, prepared, *, batch_tile=1024):
    """x: (B, input_size) float32.  prepared: output of prepare_params."""
    B, in_size = x.shape
    w0, w1, wo, pk = prepared["w0"], prepared["w1"], prepared["wo"], prepared["pk"]
    assert w0.shape[0] == in_size
    out_size = wo.shape[1]

    TB = _choose_batch_tile(B, batch_tile)
    B_pad = _round_up(B, TB)
    # Row-only padding (no feature-dim padding, no full-slab materialization).
    x_in = x if B_pad == B else jnp.pad(x, ((0, B_pad - B), (0, 0)))

    out = pl.pallas_call(
        dqn_kernel,
        grid=(B_pad // TB,),
        in_specs=[
            pl.BlockSpec((TB, in_size), lambda i: (i, 0)),   # streamed input
            pl.BlockSpec(w0.shape, lambda i: (0, 0)),        # resident weights
            pl.BlockSpec(w1.shape, lambda i: (0, 0)),
            pl.BlockSpec(wo.shape, lambda i: (0, 0)),
            pl.BlockSpec(pk.shape, lambda i: (0, 0)),        # packed bias/LN rows
        ],
        out_specs=pl.BlockSpec((TB, out_size), lambda i: (i, 0)),
        out_shape=jax.ShapeDtypeStruct((B_pad, out_size), jnp.float32),
        compiler_params=pltpu.CompilerParams(
            dimension_semantics=("parallel",),
            vmem_limit_bytes=32 * 1024 * 1024,
        ),
    )(x_in, w0, w1, wo, pk)

    return out if B_pad == B else out[:B]


def init_params(key, input_size, hidden_layers, output_size):
    """Deterministic init matching DQNetwork._init_weights:
    xavier_uniform_ on Linear weights, biases filled with 0.01,
    LayerNorm weight=1 / bias=0 (PyTorch defaults).  Stored as (in, out)."""
    assert len(hidden_layers) == 2, "kernel is specialized to 2 hidden layers"

    def xavier_uniform(key, fan_in, fan_out):
        limit = jnp.sqrt(6.0 / (fan_in + fan_out))
        # stored as (in, out) == transpose of PyTorch's (out, in)
        return jax.random.uniform(key, (fan_in, fan_out), jnp.float32,
                                  minval=-limit, maxval=limit)

    k0, k1, k2 = jax.random.split(key, 3)
    h0, h1 = hidden_layers
    return {
        "w0": xavier_uniform(k0, input_size, h0),
        "b0": jnp.full((1, h0), 0.01, jnp.float32),
        "gamma": jnp.ones((1, h0), jnp.float32),
        "beta": jnp.zeros((1, h0), jnp.float32),
        "w1": xavier_uniform(k1, h0, h1),
        "b1": jnp.full((1, h1), 0.01, jnp.float32),
        "wo": xavier_uniform(k2, h1, output_size),
        "bo": jnp.full((1, output_size), 0.01, jnp.float32),
    }


def prepare_params(params, *, weight_dtype=jnp.bfloat16):
    """Pre-cast weights to the MXU operand dtype (default bf16) and pack the
    five (1,F) bias / LayerNorm rows into one (8, max_width) f32 block so they
    arrive in a single resident DMA."""
    h0 = params["w0"].shape[1]
    h1 = params["w1"].shape[1]
    n_out = params["wo"].shape[1]
    width = max(h0, h1, n_out)
    pk = jnp.zeros((SUBLANE, width), jnp.float32)
    pk = pk.at[0, :h0].set(params["b0"][0])
    pk = pk.at[1, :h0].set(params["gamma"][0])
    pk = pk.at[2, :h0].set(params["beta"][0])
    pk = pk.at[3, :h1].set(params["b1"][0])
    pk = pk.at[4, :n_out].set(params["bo"][0])
    return {
        "w0": params["w0"].astype(weight_dtype),
        "w1": params["w1"].astype(weight_dtype),
        "wo": params["wo"].astype(weight_dtype),
        "pk": pk,
    }


def reference_forward(x, params):
    """Pure-JAX reference for correctness checking (unpadded f32 params)."""
    h = x @ params["w0"] + params["b0"]
    h = _leaky_relu(h)
    mean = jnp.mean(h, axis=-1, keepdims=True)
    var = jnp.mean(jnp.square(h - mean), axis=-1, keepdims=True)
    h = (h - mean) * lax.rsqrt(var + LN_EPS) * params["gamma"] + params["beta"]
    h = _leaky_relu(h @ params["w1"] + params["b1"])
    return h @ params["wo"] + params["bo"]


# TODO(synk): the PyTorch save()/load() checkpoint I/O has no Pallas equivalent
# and is intentionally not implemented (forward pass only).

if __name__ == "__main__":
    input_size = 32
    hidden_layers = [64, 32]
    output_size = 4

    key = jax.random.PRNGKey(0)
    kx, kx2, kp = jax.random.split(key, 3)
    params = init_params(kp, input_size, hidden_layers, output_size)

    # --- f32 weights, tiny batch (single grid step): strict check ----------
    prepared_f32 = prepare_params(params, weight_dtype=jnp.float32)
    batch = 8
    x = jax.random.normal(kx, (batch, input_size), jnp.float32)
    ref = reference_forward(x, params)
    out = jax.block_until_ready(dq_network_forward(x, prepared_f32))
    assert out.shape == (batch, output_size)
    assert jnp.allclose(out, ref, atol=1e-4, rtol=1e-4), "f32 mismatch vs reference"

    # --- f32 weights, ragged multi-tile batch (row pad, >=2 'parallel' steps)
    batch2 = 300
    x2 = jax.random.normal(kx2, (batch2, input_size), jnp.float32)
    ref2 = reference_forward(x2, params)
    out2 = jax.block_until_ready(dq_network_forward(x2, prepared_f32))
    assert out2.shape == (batch2, output_size)
    assert jnp.allclose(out2, ref2, atol=1e-4, rtol=1e-4), "tiled f32 mismatch"

    # --- default bf16 MXU operands (f32 accumulation): loose check ---------
    prepared_bf16 = prepare_params(params)        # weight_dtype=bfloat16
    out_bf16 = jax.block_until_ready(dq_network_forward(x2, prepared_bf16))
    assert out_bf16.shape == (batch2, output_size)
    assert jnp.allclose(out_bf16, ref2, atol=1e-1, rtol=1e-1), "bf16 mismatch"

    print("KERNEL_OK")
</pallas_src>

<mosaic_0001>
module attributes {stable_mosaic.version = 11 : i64} {
  func.func @dqn_kernel(%arg0: i32, %arg1: memref<8x32xf32, #tpu.memory_space<vmem>>, %arg2: memref<32x64xf32, #tpu.memory_space<vmem>>, %arg3: memref<64x32xf32, #tpu.memory_space<vmem>>, %arg4: memref<32x4xf32, #tpu.memory_space<vmem>>, %arg5: memref<8x64xf32, #tpu.memory_space<vmem>>, %arg6: memref<8x4xf32, #tpu.memory_space<vmem>>) attributes {dimension_semantics = [#tpu.dimension_semantics<parallel>], iteration_bounds = array<i64: 1>, scalar_prefetch = 0 : i64, scratch_operands = 0 : i64, tpu.core_type = #tpu.core_type<tc>, window_params = [{transform_indices = @transform_0, window_bounds = array<i64: 8, 32>}, {pipeline_mode = #tpu.pipeline_mode<synchronous>, transform_indices = @transform_1, window_bounds = array<i64: 32, 64>}, {pipeline_mode = #tpu.pipeline_mode<synchronous>, transform_indices = @transform_2, window_bounds = array<i64: 64, 32>}, {pipeline_mode = #tpu.pipeline_mode<synchronous>, transform_indices = @transform_3, window_bounds = array<i64: 32, 4>}, {pipeline_mode = #tpu.pipeline_mode<synchronous>, transform_indices = @transform_4, window_bounds = array<i64: 8, 64>}, {transform_indices = @transform_5, window_bounds = array<i64: 8, 4>}]} {
    %c0 = arith.constant 0 : index
    %c0_0 = arith.constant 0 : index
    %0 = vector.load %arg2[%c0, %c0_0] : memref<32x64xf32, #tpu.memory_space<vmem>>, vector<32x64xf32>
    %c0_1 = arith.constant 0 : index
    %c0_2 = arith.constant 0 : index
    %1 = vector.load %arg3[%c0_1, %c0_2] : memref<64x32xf32, #tpu.memory_space<vmem>>, vector<64x32xf32>
    %c0_3 = arith.constant 0 : index
    %c0_4 = arith.constant 0 : index
    %2 = vector.load %arg4[%c0_3, %c0_4] : memref<32x4xf32, #tpu.memory_space<vmem>>, vector<32x4xf32>
    %c0_5 = arith.constant 0 : index
    %c0_6 = arith.constant 0 : index
    %3 = vector.load %arg5[%c0_5, %c0_6] : memref<8x64xf32, #tpu.memory_space<vmem>>, vector<8x64xf32>
    %4 = vector.extract_strided_slice %3 {offsets = [0, 0], sizes = [1, 64], strides = [1, 1]} : vector<8x64xf32> to vector<1x64xf32>
    %5 = vector.extract_strided_slice %3 {offsets = [1, 0], sizes = [1, 64], strides = [1, 1]} : vector<8x64xf32> to vector<1x64xf32>
    %6 = vector.extract_strided_slice %3 {offsets = [2, 0], sizes = [1, 64], strides = [1, 1]} : vector<8x64xf32> to vector<1x64xf32>
    %7 = vector.extract_strided_slice %3 {offsets = [3, 0], sizes = [1, 32], strides = [1, 1]} : vector<8x64xf32> to vector<1x32xf32>
    %8 = vector.extract_strided_slice %3 {offsets = [4, 0], sizes = [1, 4], strides = [1, 1]} : vector<8x64xf32> to vector<1x4xf32>
    %c0_7 = arith.constant 0 : index
    %c0_8 = arith.constant 0 : index
    %9 = vector.load %arg1[%c0_7, %c0_8] : memref<8x32xf32, #tpu.memory_space<vmem>>, vector<8x32xf32>
    %cst = arith.constant dense<0.000000e+00> : vector<8x64xf32>
    %10 = tpu.matmul %9, %0, %cst {dimension_numbers = #tpu.dot_dimension_numbers<[1], [0], [0], [1], [0, 0, 1, 1], [], []>} : vector<8x32xf32>, vector<32x64xf32>, vector<8x64xf32> -> vector<8x64xf32>
    %11 = vector.broadcast %4 : vector<1x64xf32> to vector<8x64xf32>
    %12 = arith.addf %10, %11 : vector<8x64xf32>
    %cst_9 = arith.constant 0.000000e+00 : f32
    %13 = vector.broadcast %cst_9 : f32 to vector<8x64xf32>
    %14 = arith.cmpf ogt, %12, %13 : vector<8x64xf32>
    %cst_10 = arith.constant 0.00999999977 : f32
    %15 = vector.broadcast %cst_10 : f32 to vector<8x64xf32>
    %16 = arith.mulf %15, %12 : vector<8x64xf32>
    %17 = arith.select %14, %12, %16 : vector<8x64xi1>, vector<8x64xf32>
    %cst_11 = arith.constant dense<0.000000e+00> : vector<8xf32>
    %18 = vector.multi_reduction <add>, %17, %cst_11 [1] : vector<8x64xf32> to vector<8xf32>
    %19 = vector.shape_cast %18 : vector<8xf32> to vector<8x1xf32>
    %cst_12 = arith.constant 6.400000e+01 : f32
    %20 = vector.broadcast %cst_12 : f32 to vector<8x1xf32>
    %21 = arith.divf %19, %20 : vector<8x1xf32>
    %22 = vector.broadcast %21 : vector<8x1xf32> to vector<8x64xf32>
    %23 = arith.subf %17, %22 : vector<8x64xf32>
    %24 = arith.mulf %23, %23 : vector<8x64xf32>
    %cst_13 = arith.constant dense<0.000000e+00> : vector<8xf32>
    %25 = vector.multi_reduction <add>, %24, %cst_13 [1] : vector<8x64xf32> to vector<8xf32>
    %26 = vector.shape_cast %25 : vector<8xf32> to vector<8x1xf32>
    %cst_14 = arith.constant 6.400000e+01 : f32
    %27 = vector.broadcast %cst_14 : f32 to vector<8x1xf32>
    %28 = arith.divf %26, %27 : vector<8x1xf32>
    %cst_15 = arith.constant 9.99999974E-6 : f32
    %29 = vector.broadcast %cst_15 : f32 to vector<8x1xf32>
    %30 = arith.addf %28, %29 : vector<8x1xf32>
    %31 = math.rsqrt %30 : vector<8x1xf32>
    %32 = vector.broadcast %31 : vector<8x1xf32> to vector<8x64xf32>
    %33 = arith.mulf %23, %32 : vector<8x64xf32>
    %34 = vector.broadcast %5 : vector<1x64xf32> to vector<8x64xf32>
    %35 = arith.mulf %33, %34 : vector<8x64xf32>
    %36 = vector.broadcast %6 : vector<1x64xf32> to vector<8x64xf32>
    %37 = arith.addf %35, %36 : vector<8x64xf32>
    %cst_16 = arith.constant dense<0.000000e+00> : vector<8x32xf32>
    %38 = tpu.matmul %37, %1, %cst_16 {dimension_numbers = #tpu.dot_dimension_numbers<[1], [0], [0], [1], [0, 0, 1, 1], [], []>} : vector<8x64xf32>, vector<64x32xf32>, vector<8x32xf32> -> vector<8x32xf32>
    %39 = vector.broadcast %7 : vector<1x32xf32> to vector<8x32xf32>
    %40 = arith.addf %38, %39 : vector<8x32xf32>
    %cst_17 = arith.constant 0.000000e+00 : f32
    %41 = vector.broadcast %cst_17 : f32 to vector<8x32xf32>
    %42 = arith.cmpf ogt, %40, %41 : vector<8x32xf32>
    %cst_18 = arith.constant 0.00999999977 : f32
    %43 = vector.broadcast %cst_18 : f32 to vector<8x32xf32>
    %44 = arith.mulf %43, %40 : vector<8x32xf32>
    %45 = arith.select %42, %40, %44 : vector<8x32xi1>, vector<8x32xf32>
    %cst_19 = arith.constant dense<0.000000e+00> : vector<8x4xf32>
    %46 = tpu.matmul %45, %2, %cst_19 {dimension_numbers = #tpu.dot_dimension_numbers<[1], [0], [0], [1], [0, 0, 1, 1], [], []>} : vector<8x32xf32>, vector<32x4xf32>, vector<8x4xf32> -> vector<8x4xf32>
    %47 = vector.broadcast %8 : vector<1x4xf32> to vector<8x4xf32>
    %48 = arith.addf %46, %47 : vector<8x4xf32>
    %c0_20 = arith.constant 0 : index
    %c0_21 = arith.constant 0 : index
    %49 = vector.load %arg6[%c0_20, %c0_21] : memref<8x4xf32, #tpu.memory_space<vmem>>, vector<8x4xf32>
    tpu.vector_store %arg6[%c0_20, %c0_21], %48 {strides = array<i32>} : memref<8x4xf32, #tpu.memory_space<vmem>>, vector<8x4xf32>,
    return
  }
  func.func @transform_0(%arg0: i32) -> (i32, i32) {
    %c0_i32 = arith.constant 0 : i32
    %c0_i32_0 = arith.constant 0 : i32
    return %arg0, %c0_i32 : i32, i32
  }
  func.func @transform_1(%arg0: i32) -> (i32, i32) {
    %c0_i32 = arith.constant 0 : i32
    %c0_i32_0 = arith.constant 0 : i32
    %c0_i32_1 = arith.constant 0 : i32
    return %c0_i32, %c0_i32_0 : i32, i32
  }
  func.func @transform_2(%arg0: i32) -> (i32, i32) {
    %c0_i32 = arith.constant 0 : i32
    %c0_i32_0 = arith.constant 0 : i32
    %c0_i32_1 = arith.constant 0 : i32
    return %c0_i32, %c0_i32_0 : i32, i32
  }
  func.func @transform_3(%arg0: i32) -> (i32, i32) {
    %c0_i32 = arith.constant 0 : i32
    %c0_i32_0 = arith.constant 0 : i32
    %c0_i32_1 = arith.constant 0 : i32
    return %c0_i32, %c0_i32_0 : i32, i32
  }
  func.func @transform_4(%arg0: i32) -> (i32, i32) {
    %c0_i32 = arith.constant 0 : i32
    %c0_i32_0 = arith.constant 0 : i32
    %c0_i32_1 = arith.constant 0 : i32
    return %c0_i32, %c0_i32_0 : i32, i32
  }
  func.func @transform_5(%arg0: i32) -> (i32, i32) {
    %c0_i32 = arith.constant 0 : i32
    %c0_i32_0 = arith.constant 0 : i32
    return %arg0, %c0_i32 : i32, i32
  }
}

</mosaic_0001>

<bundles_post_ra>
// kernel: tpu_custom_call.1
= control target key start
LH: loop header
LB: loop body
LE: loop exit
PB: predicated region body
PF: predicated region fallthrough
CT: control target
= control target key end

     0   :  { %vm39_vm0 = vcmask 261120   ;;  %vm66_vm2 = vcmask 523264   ;;  %v165_v12 = vmov 64.0   ;;  %vm151_vm8 = vcmask 31744   ;;  %s265_s1 = inlined_call_operand.vmem [shape: f32[32,64], index: 1, kind: input, shape index: {}]   ;;  %s266_s0 = inlined_call_operand.vmem [shape: f32[8,32], index: 0, kind: input, shape index: {}]   ;;  %s267_s4 = inlined_call_operand.vmem [shape: f32[8,64], index: 4, kind: input, shape index: {}]   ;;  %s268_s2 = inlined_call_operand.vmem [shape: f32[64,32], index: 2, kind: input, shape index: {}]   ;;  %s269_s3 = inlined_call_operand.vmem [shape: f32[32,4], index: 3, kind: input, shape index: {}]   ;;  %s270_s5 = inlined_call_operand.vmem [shape: f32[8,4], index: 5, kind: output, shape index: {}]  }
   0x1   :  { %v23_v0 = vld [vmem:[%s265_s1 + $0x18] sm:$0xff]  ;;  %v22_v1 = vld [vmem:[%s265_s1 + $0x10] sm:$0xff]  ;;  %v21_v2 = vld [vmem:[%s265_s1 + $0x8] sm:$0xff]  ;;  %161 = vrcp.f32 %v165_v12 }
   0x2   :  { %55 = vmatpush.msra.mxu0 %v23_v0  ;;  %v20_v3 = vld [vmem:[%s265_s1] sm:$0xff]  ;;  %v31_v24 = vld [vmem:[%s268_s2 + $0x38] sm:$0xff]  ;;  %v30_v25 = vld [vmem:[%s268_s2 + $0x30] sm:$0xff] }
   0x3   :  { %v37_v4 = vld [vmem:[%s266_s0] sm:$0xff]  ;;  %112 = vmatpush.msra.mxu1 %v31_v24  ;;  %v29_v26 = vld [vmem:[%s268_s2 + $0x28] sm:$0xff]  ;;  %v27_v28 = vld [vmem:[%s268_s2 + $0x18] sm:$0xff] }
   0x4   :  { %56 = vmatpush.msra.mxu0 %v22_v1  ;;  %v215_v5 = vld [vmem:[%s267_s4] sm:$0xff]  ;;  %v26_v29 = vld [vmem:[%s268_s2 + $0x10] sm:$0xff]  ;;  %v25_v30 = vld [vmem:[%s268_s2 + $0x8] sm:$0xff] }
   0x5   :  { %v38_v6 = vperm.slane %v215_v5, 0  ;;  %113 = vmatpush.msra.mxu1 %v30_v25  ;;  %v28_v27 = vld [vmem:[%s268_s2 + $0x20] sm:$0xff]  ;;  %v35_v32 = vld [vmem:[%s269_s3 + $0x18] sm:$0xff]  ;;  %v96_v42 = vperm.slane %v215_v5, 1  ;;  %v98_v45 = vperm.slane %v215_v5, 2  ;;  %v34_v48 = vld [vmem:[%s269_s3 + $0x10] sm:$0xff] }
   0x6   :  { %57 = vmatpush.msra.mxu0 %v21_v2  ;;  %v24_v31 = vld [vmem:[%s268_s2] sm:$0xff]  ;;  %143 = vmatpush.msra.mxu2 %v35_v32  ;;  %v33_v49 = vld [vmem:[%s269_s3 + $0x8] sm:$0xff]  ;;  %v100_v51 = vperm.slane %v215_v5, 3  ;;  %v127_v56 = vperm.slane %v215_v5, 4 }
   0x7   :  { %v162_v13 = vpop.eup %161  ;;  %114 = vmatpush.msra.mxu1 %v29_v26  ;;  %v32_v50 = vld [vmem:[%s269_s3] sm:$0xff] }
   0x8   :  { %58 = vmatpush.msra.mxu0 %v20_v3  ;;  %v71_v14 = vmul.f32 64.0, %v162_v13  ;;  %vm75_vm3 = vweird.f32 %v162_v13  ;;  %144 = vmatpush.msra.mxu2 %v34_v48 }
   0x9   :  { %157 = vmatmul.msk.f32.vlgmr.msra.gmra.mxu0 %vm39_vm0, %v37_v4  ;;  %115 = vmatpush.msra.mxu1 %v28_v27 }
   0xa   :  { %v72_v15 = vsub.f32 1.0, %v71_v14  ;;  %145 = vmatpush.msra.mxu2 %v33_v49 }
   0xb   :  { %116 = vmatpush.msra.mxu1 %v27_v28 }
   0xc   :  { %v73_v16 = vmul.f32 %v162_v13, %v72_v15  ;;  %146 = vmatpush.msra.mxu2 %v32_v50 }
   0xd   :  { %117 = vmatpush.msra.mxu1 %v26_v29 }
   0xe   :  { %v74_v17 = vadd.f32 %v162_v13, %v73_v16 }
   0xf   :  { %118 = vmatpush.msra.mxu1 %v25_v30 }
  0x10   :  { %v76_v18 = vsel %vm75_vm3, %v162_v13, %v74_v17 }
  0x11   :  { %119 = vmatpush.msra.mxu1 %v24_v31 }
  0x86   :  { %v60_v7 = vpop.f32.mrf.mxu0 }
  0x87   :  { %v61_v8 = vadd.f32 %v60_v7, %v38_v6 }
  0x89   :  { %v64_v9 = vmul.f32 0.01, %v61_v8  ;;  %vm63_vm1 = vcmp.gt.f32.partialorder %v61_v8, 0.0 }
  0x8b   :  { %v65_v10 = vsel %vm63_vm1, %v61_v8, %v64_v9 }
  0x8c   :  { %v67_v11 = vsel %vm66_vm2, %v65_v10, 0.0 }
  0x8d   :  { %68 = vadd.xlane.f32.xlu0 %v67_v11 }
 0x100   :  { %v69_v19 = vpop.xlane.xlu0 %68 }
 0x101   :  { %v77_v20 = vmul.f32 %v76_v18, %v69_v19 }
 0x103   :  { %v78_v21 = vsub.f32 %v65_v10, %v77_v20 }
 0x105   :  { %v79_v22 = vmul.f32 %v78_v21, %v78_v21 }
 0x107   :  { %v80_v23 = vsel %vm66_vm2, %v79_v22, 0.0 }
 0x108   :  { %81 = vadd.xlane.f32.xlu0 %v80_v23 }
 0x17b   :  { %v82_v33 = vpop.xlane.xlu0 %81 }
 0x17c   :  { %v83_v34 = vmul.f32 %v82_v33, %v76_v18 }
 0x17e   :  { %v84_v35 = vadd.f32 1e-05, %v83_v34 }
 0x180   :  { %163 = vrsqrt.f32 %v84_v35  ;;  %vm91_vm5 = vweird.f32 %v84_v35 }
 0x186   :  { %v164_v36 = vpop.eup %163 }
 0x187   :  { %v86_v37 = vmul.f32 %v164_v36, %v84_v35  ;;  %vm92_vm4 = vweird.f32 %v164_v36 }
 0x188   :  { %vm93_vm6 = vmor %vm91_vm5, %vm92_vm4 }
 0x189   :  { %v87_v38 = vmul.f32 %v164_v36, %v86_v37 }
 0x18b   :  { %v88_v39 = vmul.f32 0.5, %v87_v38 }
 0x18d   :  { %v89_v40 = vsub.f32 1.5, %v88_v39 }
 0x18f   :  { %v90_v41 = vmul.f32 %v164_v36, %v89_v40 }
 0x191   :  { %v94_v43 = vsel %vm93_vm6, %v164_v36, %v90_v41 }
 0x192   :  { %v95_v44 = vmul.f32 %v94_v43, %v78_v21 }
 0x194   :  { %v97_v46 = vmul.f32 %v96_v42, %v95_v44 }
 0x196   :  { %v99_v47 = vadd.f32 %v98_v45, %v97_v46 }
 0x198   :  { %158 = vmatmul.msk.f32.vlgmr.msra.gmra.mxu1 %vm66_vm2, %v99_v47 }
 0x215   :  { %v121_v52 = vpop.f32.mrf.mxu1 }
 0x216   :  { %v122_v53 = vadd.f32 %v121_v52, %v100_v51 }
 0x218   :  { %v125_v54 = vmul.f32 0.01, %v122_v53  ;;  %vm124_vm7 = vcmp.gt.f32.partialorder %v122_v53, 0.0 }
 0x21a   :  { %v126_v55 = vsel %vm124_vm7, %v122_v53, %v125_v54 }
 0x21b   :  { %159 = vmatmul.msk.f32.vlgmr.msra.gmra.mxu2 %vm39_vm0, %v126_v55 }
 0x29e   :  { %v148_v57 = vpop.f32.mrf.mxu2 }
 0x29f   :  { %v149_v58 = vadd.f32 %v148_v57, %v127_v56 }
 0x2a1   :  { %152 = vst.msk [vmem:[%s270_s5] sm:$0xff] %vm151_vm8, %v149_v58 }

</bundles_post_ra>
